<compile_context>
chip_gen: v6e
topology: v6e:2x2x1
jax: 0.10.0
libtpu: 0.0.40
codegen_flags: <defaults>
</compile_context>

<pallas_src>
import jax
import jax.numpy as jnp
from jax.experimental import pallas as pl
from jax.experimental.pallas import tpu as pltpu

LANES = 128
MAX_TILE_ROWS = 2048   # 2048 * 128 * 4 B = 1 MiB f32 tile per input
ROW_ALIGN = 32         # sublane-group alignment safe for f32/bf16/int8 inputs


def _inv_mae_partial_kernel(p_ref, t_ref, m_ref, err_ref, cnt_ref):
    """Per-tile partial sums of |1/p - 1/t| * m and m, folded to (8, 128)."""
    p = p_ref[...].astype(jnp.float32)
    t = t_ref[...].astype(jnp.float32)
    m = m_ref[...].astype(jnp.float32)

    # |1/p - 1/t| == |(t - p) / (p * t)|: one exact divide per element keeps
    # the VALU slot off the critical path of this HBM-bound kernel.
    diff = jnp.abs((t - p) / (p * t))
    # Masked-out elements cannot inject NaN/Inf into the sum (strictly safer
    # than the PyTorch reference, which would NaN on masked zero depths).
    err = jnp.where(m > 0.0, diff * m, 0.0)

    rows = err.shape[0]
    # Fold the sublane axis to a single (8,128) vreg: pure VPU adds, no
    # per-step cross-lane XLU reduction, lane-dense (unmasked) output stores.
    err_ref[...] = err.reshape(1, rows // 8, 8, LANES).sum(axis=1)
    cnt_ref[...] = m.reshape(1, rows // 8, 8, LANES).sum(axis=1)


def _round_up(x, m):
    return (x + m - 1) // m * m


@jax.jit
def inverse_metric_wrapper(preds, target, valid_mask=None):
    """JAX/Pallas equivalent of InverseMetricWrapper(MaskedMAE)(preds, target, mask)."""
    if valid_mask is None:
        valid_mask = jnp.ones(preds.shape, dtype=jnp.float32)

    n = preds.size
    rows = pl.cdiv(n, LANES)
    tile_rows = min(MAX_TILE_ROWS, _round_up(rows, ROW_ALIGN))
    rows_padded = _round_up(rows, tile_rows)
    n_padded = rows_padded * LANES

    def _flat_pad(x, fill):
        x = x.reshape(-1)
        x = jnp.pad(x, (0, n_padded - n), constant_values=fill)
        return x.reshape(rows_padded, LANES)

    # Native dtypes go straight into the kernel; padding is mask-exact.
    p2 = _flat_pad(preds, 1)
    t2 = _flat_pad(target, 1)
    m2 = _flat_pad(valid_mask, 0)

    num_tiles = rows_padded // tile_rows
    tile_spec = pl.BlockSpec((tile_rows, LANES), lambda i: (i, 0))
    part_spec = pl.BlockSpec((1, 8, LANES), lambda i: (i, 0, 0))

    err_part, cnt_part = pl.pallas_call(
        _inv_mae_partial_kernel,
        out_shape=(
            jax.ShapeDtypeStruct((num_tiles, 8, LANES), jnp.float32),
            jax.ShapeDtypeStruct((num_tiles, 8, LANES), jnp.float32),
        ),
        grid_spec=pltpu.PrefetchScalarGridSpec(
            num_scalar_prefetch=0,
            grid=(num_tiles,),
            in_specs=[tile_spec, tile_spec, tile_spec],
            out_specs=(part_spec, part_spec),
        ),
        compiler_params=pltpu.CompilerParams(
            dimension_semantics=("parallel",),   # shards tiles across TCs on v7x
        ),
    )(p2, t2, m2)

    err = jnp.sum(err_part)
    cnt = jnp.sum(cnt_part)
    # TODO(synk): PyTorch's try/except (return 0.0 on metric failure) has no
    # runtime equivalent in JAX; we emulate the common failure (empty mask) by
    # returning 0.0 when sum(mask) == 0.
    return jnp.where(cnt > 0.0, err / jnp.maximum(cnt, 1.0), 0.0)


def _reference(preds, target, valid_mask):
    inv_p = 1.0 / preds
    inv_t = 1.0 / target
    m = valid_mask
    denom = jnp.sum(m)
    return jnp.where(denom > 0, jnp.sum(jnp.abs(inv_p - inv_t) * m) / denom, 0.0)


if __name__ == "__main__":
    key = jax.random.PRNGKey(0)
    kp, kt, km = jax.random.split(key, 3)

    B, C, H, W = 2, 4, 16, 16  # NCHW, 2048 elements total
    # Depth-like positive inputs so reciprocals are finite.
    preds = 0.5 + jax.random.uniform(kp, (B, C, H, W), jnp.float32) * 4.0
    target = 0.5 + jax.random.uniform(kt, (B, C, H, W), jnp.float32) * 4.0
    valid_mask = (jax.random.uniform(km, (B, C, H, W)) > 0.25).astype(jnp.float32)

    out = inverse_metric_wrapper(preds, target, valid_mask)
    out = jax.block_until_ready(out)

    ref = _reference(preds, target, valid_mask)
    assert jnp.allclose(out, ref, rtol=1e-5, atol=1e-6), (out, ref)

    print("KERNEL_OK")
</pallas_src>

<mosaic_0001>
module attributes {stable_mosaic.version = 11 : i64} {
  func.func @_inv_mae_partial_kernel(%arg0: i32, %arg1: memref<32x128xf32, #tpu.memory_space<vmem>>, %arg2: memref<32x128xf32, #tpu.memory_space<vmem>>, %arg3: memref<32x128xf32, #tpu.memory_space<vmem>>, %arg4: memref<1x8x128xf32, #tpu.memory_space<vmem>>, %arg5: memref<1x8x128xf32, #tpu.memory_space<vmem>>) attributes {dimension_semantics = [#tpu.dimension_semantics<parallel>], iteration_bounds = array<i64: 1>, scalar_prefetch = 0 : i64, scratch_operands = 0 : i64, tpu.core_type = #tpu.core_type<tc>, window_params = [{transform_indices = @transform_0, window_bounds = array<i64: 32, 128>}, {transform_indices = @transform_1, window_bounds = array<i64: 32, 128>}, {transform_indices = @transform_2, window_bounds = array<i64: 32, 128>}, {transform_indices = @transform_3, window_bounds = array<i64: 1, 8, 128>}, {transform_indices = @transform_4, window_bounds = array<i64: 1, 8, 128>}]} {
    %c0 = arith.constant 0 : index
    %c0_0 = arith.constant 0 : index
    %0 = vector.load %arg1[%c0, %c0_0] : memref<32x128xf32, #tpu.memory_space<vmem>>, vector<32x128xf32>
    %c0_1 = arith.constant 0 : index
    %c0_2 = arith.constant 0 : index
    %1 = vector.load %arg2[%c0_1, %c0_2] : memref<32x128xf32, #tpu.memory_space<vmem>>, vector<32x128xf32>
    %c0_3 = arith.constant 0 : index
    %c0_4 = arith.constant 0 : index
    %2 = vector.load %arg3[%c0_3, %c0_4] : memref<32x128xf32, #tpu.memory_space<vmem>>, vector<32x128xf32>
    %3 = arith.subf %1, %0 : vector<32x128xf32>
    %4 = arith.mulf %0, %1 : vector<32x128xf32>
    %5 = arith.divf %3, %4 : vector<32x128xf32>
    %6 = math.absf %5 : vector<32x128xf32>
    %cst = arith.constant 0.000000e+00 : f32
    %7 = vector.broadcast %cst : f32 to vector<32x128xf32>
    %8 = arith.cmpf ogt, %2, %7 : vector<32x128xf32>
    %9 = arith.mulf %6, %2 : vector<32x128xf32>
    %cst_5 = arith.constant 0.000000e+00 : f32
    %10 = vector.broadcast %cst_5 : f32 to vector<32x128xf32>
    %11 = arith.select %8, %9, %10 : vector<32x128xi1>, vector<32x128xf32>
    %12 = vector.shape_cast %11 : vector<32x128xf32> to vector<1x4x8x128xf32>
    %cst_6 = arith.constant dense<0.000000e+00> : vector<1x8x128xf32>
    %13 = vector.multi_reduction <add>, %12, %cst_6 [1] : vector<1x4x8x128xf32> to vector<1x8x128xf32>
    %c0_7 = arith.constant 0 : index
    %c0_8 = arith.constant 0 : index
    %c0_9 = arith.constant 0 : index
    %14 = vector.load %arg4[%c0_7, %c0_8, %c0_9] : memref<1x8x128xf32, #tpu.memory_space<vmem>>, vector<1x8x128xf32>
    tpu.vector_store %arg4[%c0_7, %c0_8, %c0_9], %13 {strides = array<i32>} : memref<1x8x128xf32, #tpu.memory_space<vmem>>, vector<1x8x128xf32>,
    %15 = vector.shape_cast %2 : vector<32x128xf32> to vector<1x4x8x128xf32>
    %cst_10 = arith.constant dense<0.000000e+00> : vector<1x8x128xf32>
    %16 = vector.multi_reduction <add>, %15, %cst_10 [1] : vector<1x4x8x128xf32> to vector<1x8x128xf32>
    %c0_11 = arith.constant 0 : index
    %c0_12 = arith.constant 0 : index
    %c0_13 = arith.constant 0 : index
    %17 = vector.load %arg5[%c0_11, %c0_12, %c0_13] : memref<1x8x128xf32, #tpu.memory_space<vmem>>, vector<1x8x128xf32>
    tpu.vector_store %arg5[%c0_11, %c0_12, %c0_13], %16 {strides = array<i32>} : memref<1x8x128xf32, #tpu.memory_space<vmem>>, vector<1x8x128xf32>,
    return
  }
  func.func @transform_0(%arg0: i32) -> (i32, i32) {
    %c0_i32 = arith.constant 0 : i32
    %c0_i32_0 = arith.constant 0 : i32
    return %arg0, %c0_i32 : i32, i32
  }
  func.func @transform_1(%arg0: i32) -> (i32, i32) {
    %c0_i32 = arith.constant 0 : i32
    %c0_i32_0 = arith.constant 0 : i32
    return %arg0, %c0_i32 : i32, i32
  }
  func.func @transform_2(%arg0: i32) -> (i32, i32) {
    %c0_i32 = arith.constant 0 : i32
    %c0_i32_0 = arith.constant 0 : i32
    return %arg0, %c0_i32 : i32, i32
  }
  func.func @transform_3(%arg0: i32) -> (i32, i32, i32) {
    %c0_i32 = arith.constant 0 : i32
    %c0_i32_0 = arith.constant 0 : i32
    %c0_i32_1 = arith.constant 0 : i32
    return %arg0, %c0_i32, %c0_i32_0 : i32, i32, i32
  }
  func.func @transform_4(%arg0: i32) -> (i32, i32, i32) {
    %c0_i32 = arith.constant 0 : i32
    %c0_i32_0 = arith.constant 0 : i32
    %c0_i32_1 = arith.constant 0 : i32
    return %arg0, %c0_i32, %c0_i32_0 : i32, i32, i32
  }
}

</mosaic_0001>

<bundles_post_ra>
// kernel: inverse_metric_wrapper.1
= control target key start
LH: loop header
LB: loop body
LE: loop exit
PB: predicated region body
PF: predicated region fallthrough
CT: control target
= control target key end

     0   :  { %s151_s0 = inlined_call_operand.vmem [shape: f32[32,128], index: 0, kind: input, shape index: {}]   ;;  %s152_s1 = inlined_call_operand.vmem [shape: f32[32,128], index: 1, kind: input, shape index: {}]   ;;  %s153_s2 = inlined_call_operand.vmem [shape: f32[32,128], index: 2, kind: input, shape index: {}]   ;;  %s154_s4 = inlined_call_operand.vmem [shape: f32[1,8,128], index: 4, kind: output, shape index: {1}]   ;;  %s155_s3 = inlined_call_operand.vmem [shape: f32[1,8,128], index: 3, kind: output, shape index: {0}]  }
   0x1   :  { %v16_v0 = vld [vmem:[%s151_s0] sm:$0xff]  ;;  %v17_v1 = vld [vmem:[%s151_s0 + $0x8] sm:$0xff]  ;;  %v18_v2 = vld [vmem:[%s151_s0 + $0x10] sm:$0xff] }
   0x2   :  { %v19_v3 = vld [vmem:[%s151_s0 + $0x18] sm:$0xff]  ;;  %v20_v4 = vld [vmem:[%s152_s1] sm:$0xff]  ;;  %v21_v5 = vld [vmem:[%s152_s1 + $0x8] sm:$0xff] }
   0x3   :  { %v22_v6 = vld [vmem:[%s152_s1 + $0x10] sm:$0xff]  ;;  %v23_v7 = vld [vmem:[%s152_s1 + $0x18] sm:$0xff]  ;;  %v32_v8 = vmul.f32 %v20_v4, %v16_v0  ;;  %v33_v9 = vmul.f32 %v21_v5, %v17_v1  ;;  %v24_v12 = vld [vmem:[%s153_s2] sm:$0xff]  ;;  %v28_v19 = vsub.f32 %v20_v4, %v16_v0  ;;  %v29_v20 = vsub.f32 %v21_v5, %v17_v1 }
   0x4   :  { %v34_v10 = vmul.f32 %v22_v6, %v18_v2  ;;  %v35_v11 = vmul.f32 %v23_v7, %v19_v3  ;;  %v25_v13 = vld [vmem:[%s153_s2 + $0x8] sm:$0xff]  ;;  %v26_v15 = vld [vmem:[%s153_s2 + $0x10] sm:$0xff]  ;;  %v27_v17 = vld [vmem:[%s153_s2 + $0x18] sm:$0xff]  ;;  %v30_v21 = vsub.f32 %v22_v6, %v18_v2  ;;  %v31_v23 = vsub.f32 %v23_v7, %v19_v3 }
   0x5   :  { %76 = vrcp.f32 %v32_v8  ;;  %v64_v14 = vadd.f32 %v25_v13, %v24_v12  ;;  %vm48_vm0 = vcmp.gt.f32.partialorder %v24_v12, 0.0  ;;  %vm49_vm1 = vcmp.gt.f32.partialorder %v25_v13, 0.0 }
   0x6   :  { %78 = vrcp.f32 %v33_v9  ;;  %vm50_vm2 = vcmp.gt.f32.partialorder %v26_v15, 0.0  ;;  %vm51_vm3 = vcmp.gt.f32.partialorder %v27_v17, 0.0 }
   0x7   :  { %80 = vrcp.f32 %v34_v10  ;;  %v65_v16 = vadd.f32 %v64_v14, %v26_v15 }
   0x8   :  { %82 = vrcp.f32 %v35_v11 }
   0x9   :  { %v66_v18 = vadd.f32 %v65_v16, %v27_v17 }
   0xb   :  { %67 = vst [vmem:[%s154_s4] sm:$0xff] %v66_v18 }
  0x12   :  { %v77_v22 = vpop.eup %76 }
  0x13   :  { %v79_v24 = vpop.eup %78  ;;  %v37_v25 = vmul.f32 %v77_v22, %v28_v19 }
  0x14   :  { %v81_v26 = vpop.eup %80  ;;  %v39_v27 = vmul.f32 %v79_v24, %v29_v20 }
  0x15   :  { %v83_v28 = vpop.eup %82  ;;  %v41_v29 = vmul.f32 %v81_v26, %v30_v21  ;;  %v44_v30 = vand.u32 2147483647, %v37_v25 }
  0x16   :  { %v43_v31 = vmul.f32 %v83_v28, %v31_v23  ;;  %v45_v32 = vand.u32 2147483647, %v39_v27 }
  0x17   :  { %v46_v33 = vand.u32 2147483647, %v41_v29  ;;  %v52_v34 = vmul.f32 %v44_v30, %v24_v12 }
  0x18   :  { %v47_v35 = vand.u32 2147483647, %v43_v31  ;;  %v53_v36 = vmul.f32 %v45_v32, %v25_v13 }
  0x19   :  { %v54_v37 = vmul.f32 %v46_v33, %v26_v15  ;;  %v56_v38 = vsel %vm48_vm0, %v52_v34, 0.0 }
  0x1a   :  { %v55_v39 = vmul.f32 %v47_v35, %v27_v17  ;;  %v57_v40 = vsel %vm49_vm1, %v53_v36, 0.0 }
  0x1b   :  { %v58_v41 = vsel %vm50_vm2, %v54_v37, 0.0  ;;  %v60_v42 = vadd.f32 %v57_v40, %v56_v38 }
  0x1c   :  { %v59_v43 = vsel %vm51_vm3, %v55_v39, 0.0 }
  0x1d   :  { %v61_v44 = vadd.f32 %v60_v42, %v58_v41 }
  0x1f   :  { %v62_v45 = vadd.f32 %v61_v44, %v59_v43 }
  0x21   :  { %63 = vst [vmem:[%s155_s3] sm:$0xff] %v62_v45 }

</bundles_post_ra>
